<compile_context>
chip_gen: v7x
topology: tpu7x:2x2x1
jax: 0.10.0
libtpu: 0.0.40
codegen_flags: <defaults>
</compile_context>

<pallas_src>
import numpy as np
import jax
import jax.numpy as jnp
from jax.experimental import pallas as pl
from jax.experimental.pallas import tpu as pltpu


def _conv_mm_kernel(w_ref, a_ref, o_ref):
    # w_ref: (C_BLK, K+1) weight block (last column = effective bias)
    # a_ref: (K+1, M_pad) im2col patches + ones row (lane-dense, 128-aligned)
    # o_ref: (C_BLK, M_pad)
    o_ref[...] = jnp.dot(
        w_ref[...], a_ref[...], preferred_element_type=jnp.float32
    ).astype(o_ref.dtype)


def _other_channel_term(other):
    """Per-channel additive term for `other`; None when it is provably zero."""
    if isinstance(other, jax.core.Tracer):
        return other.sum(axis=(1, 2, 3))          # preserve semantics when traced
    if np.any(np.asarray(other)):
        return jnp.asarray(other).sum(axis=(1, 2, 3))
    return None                                   # all-zeros constant: adds nothing


def conv2d_3x3_s2_pallas(x_nchw, weight_oihw, bias, other, *, return_lane_dense=False):
    """Conv2d(3->224, k=3, s=2, pad=VALID) + bias + (zero) `other` term.

    x_nchw:      (N, 3, H, W)   float32
    weight_oihw: (224, 3, 3, 3) float32 (PyTorch OIHW layout)
    bias:        (224,)         float32
    other:       (224, 3, 3, 3) float32 (all zeros -- see TODO above)
    returns:     (N, 224, OH, OW) float32 NCHW, or the raw lane-dense (COUT, M_pad)
                 kernel output when return_lane_dense=True (skips the relayout copy).
    """
    N, C, H, W = x_nchw.shape
    COUT, CIN, KH, KW = weight_oihw.shape
    assert C == CIN
    SH = SW = 2
    OH = (H - KH) // SH + 1
    OW = (W - KW) // SW + 1
    K = CIN * KH * KW
    M = N * OH * OW
    M_pad = ((M + 127) // 128) * 128        # lane-dense output: only unmasked stores
    K_aug = K + 1                           # ones row carries the bias through the MXU

    # ---- XLA glue: im2col directly in (K, M) layout from NCHW (single small fusion) ----
    cols = []
    for kh in range(KH):
        for kw in range(KW):
            cols.append(x_nchw[:, :, kh:kh + SH * OH:SH, kw:kw + SW * OW:SW])  # (N,C,OH,OW)
    patches = jnp.stack(cols, axis=2)                      # (N, C, KH*KW, OH, OW)
    if N == 1:
        a = patches.reshape(K, M)                          # rows: k = c*9 + kh*3 + kw
    else:
        a = jnp.moveaxis(patches, 0, 2).reshape(K, M)      # cols ordered (n, oh, ow)
    a = jnp.concatenate([a, jnp.ones((1, M), a.dtype)], axis=0)   # bias row
    a = jnp.pad(a, ((0, 0), (0, M_pad - M)))                      # (K_aug, M_pad)

    # ---- effective bias: skip the `other` fold when it is provably zero ----
    term = _other_channel_term(other)
    bias_eff = bias if term is None else bias + term
    w_aug = jnp.concatenate(
        [weight_oihw.reshape(COUT, K), bias_eff.reshape(COUT, 1)], axis=1
    )                                                             # (COUT, K_aug)

    # ---- 2-way COUT grid: splits across both TensorCores on v7x (sequential,
    #      pipelined steps on single-core v5e/v6e) ----
    n_blk = 2 if COUT % 16 == 0 else 1
    c_blk = COUT // n_blk

    out_t = pl.pallas_call(
        _conv_mm_kernel,
        out_shape=jax.ShapeDtypeStruct((COUT, M_pad), jnp.float32),
        grid_spec=pltpu.PrefetchScalarGridSpec(
            num_scalar_prefetch=0,
            grid=(n_blk,),
            in_specs=[
                pl.BlockSpec((c_blk, K_aug), lambda i: (i, 0)),   # weight block per core
                pl.BlockSpec((K_aug, M_pad), lambda i: (0, 0)),   # A: same block every step
            ],
            out_specs=pl.BlockSpec((c_blk, M_pad), lambda i: (i, 0)),
        ),
        compiler_params=pltpu.CompilerParams(dimension_semantics=("parallel",)),
        cost_estimate=pl.CostEstimate(
            flops=2 * COUT * K_aug * M_pad,
            transcendentals=0,
            bytes_accessed=4 * (COUT * K_aug + K_aug * M_pad + COUT * M_pad),
        ),
    )(w_aug, a)

    if return_lane_dense:
        return out_t   # (COUT, M_pad): no relayout; cols 0..M-1 are (n, oh, ow)-ordered

    # NOTE: this is a real relayout copy on TPU (different tiled layouts), not a free
    # bitcast.  Slice and reshape are adjacent so XLA fuses them into ONE copy fusion.
    if N == 1:
        return out_t[:, :M].reshape(1, COUT, OH, OW)
    out = out_t[:, :M].reshape(COUT, N, OH, OW)
    return jnp.transpose(out, (1, 0, 2, 3))


def _reference(x_nchw, weight_oihw, bias, other):
    y = jax.lax.conv_general_dilated(
        x_nchw, weight_oihw,
        window_strides=(2, 2), padding="VALID",
        dimension_numbers=("NCHW", "OIHW", "NCHW"),
    )
    y = y + bias.reshape(1, -1, 1, 1)
    return y + other.sum(axis=(1, 2, 3)).reshape(1, -1, 1, 1)


if __name__ == "__main__":
    key = jax.random.PRNGKey(0)
    k_x, k_w, k_b = jax.random.split(key, 3)

    # shapes implied by the module: x2 = randn(1, 3, 64, 64), Conv2d(3, 224, k=3, s=2)
    x2 = jax.random.normal(k_x, (1, 3, 64, 64), dtype=jnp.float32)
    weight = jax.random.normal(k_w, (224, 3, 3, 3), dtype=jnp.float32) * 0.1
    bias = jax.random.normal(k_b, (224,), dtype=jnp.float32) * 0.1
    other = jnp.zeros((224, 3, 3, 3), dtype=jnp.float32)

    out = jax.block_until_ready(conv2d_3x3_s2_pallas(x2, weight, bias, other))
    ref = jax.block_until_ready(_reference(x2, weight, bias, other))

    assert out.shape == (1, 224, 31, 31), out.shape
    assert jnp.allclose(out, ref, atol=1e-4, rtol=1e-4), float(
        jnp.max(jnp.abs(out - ref))
    )
    print("KERNEL_OK")
</pallas_src>

<mosaic_0001>
module attributes {stable_mosaic.version = 11 : i64} {
  func.func @_conv_mm_kernel(%arg0: i32, %arg1: memref<112x28xf32, #tpu.memory_space<vmem>>, %arg2: memref<28x1024xf32, #tpu.memory_space<vmem>>, %arg3: memref<112x1024xf32, #tpu.memory_space<vmem>>) attributes {dimension_semantics = [#tpu.dimension_semantics<parallel>], iteration_bounds = array<i64: 2>, scalar_prefetch = 0 : i64, scratch_operands = 0 : i64, tpu.core_type = #tpu.core_type<tc>, window_params = [{transform_indices = @transform_0, window_bounds = array<i64: 112, 28>}, {pipeline_mode = #tpu.pipeline_mode<synchronous>, transform_indices = @transform_1, window_bounds = array<i64: 28, 1024>}, {transform_indices = @transform_2, window_bounds = array<i64: 112, 1024>}]} {
    %c0 = arith.constant 0 : index
    %c0_0 = arith.constant 0 : index
    %0 = vector.load %arg1[%c0, %c0_0] : memref<112x28xf32, #tpu.memory_space<vmem>>, vector<112x28xf32>
    %c0_1 = arith.constant 0 : index
    %c0_2 = arith.constant 0 : index
    %1 = vector.load %arg2[%c0_1, %c0_2] : memref<28x1024xf32, #tpu.memory_space<vmem>>, vector<28x1024xf32>
    %cst = arith.constant dense<0.000000e+00> : vector<112x1024xf32>
    %2 = tpu.matmul %0, %1, %cst {dimension_numbers = #tpu.dot_dimension_numbers<[1], [0], [0], [1], [0, 0, 1, 1], [], []>} : vector<112x28xf32>, vector<28x1024xf32>, vector<112x1024xf32> -> vector<112x1024xf32>
    %c0_3 = arith.constant 0 : index
    %c0_4 = arith.constant 0 : index
    %3 = vector.load %arg3[%c0_3, %c0_4] : memref<112x1024xf32, #tpu.memory_space<vmem>>, vector<112x1024xf32>
    tpu.vector_store %arg3[%c0_3, %c0_4], %2 {strides = array<i32>} : memref<112x1024xf32, #tpu.memory_space<vmem>>, vector<112x1024xf32>,
    return
  }
  func.func @transform_0(%arg0: i32) -> (i32, i32) {
    %c0_i32 = arith.constant 0 : i32
    %c0_i32_0 = arith.constant 0 : i32
    return %arg0, %c0_i32 : i32, i32
  }
  func.func @transform_1(%arg0: i32) -> (i32, i32) {
    %c0_i32 = arith.constant 0 : i32
    %c0_i32_0 = arith.constant 0 : i32
    %c0_i32_1 = arith.constant 0 : i32
    return %c0_i32, %c0_i32_0 : i32, i32
  }
  func.func @transform_2(%arg0: i32) -> (i32, i32) {
    %c0_i32 = arith.constant 0 : i32
    %c0_i32_0 = arith.constant 0 : i32
    return %arg0, %c0_i32 : i32, i32
  }
}

</mosaic_0001>

<bundles_post_ra>
// kernel: tpu_custom_call.1
= control target key start
LH: loop header
LB: loop body
LE: loop exit
PB: predicated region body
PF: predicated region fallthrough
CT: control target
= control target key end

     0   :  { %7 = vsyncpa [#allocation3], 0  ;;  %s1814_s0 = inlined_call_operand.vmem [shape: f32[224,28], index: 0, kind: input, shape index: {}]   ;;  %s1815_s1 = inlined_call_operand.vmem [shape: f32[28,1024], index: 1, kind: input, shape index: {}]   ;;  %s1816_s2 = inlined_call_operand.hbm [shape: f32[224,1024], index: 2, kind: output, shape index: {}]  }
   0x1   :  { %9 = vsyncpa [#allocation3 + $0x1], 0  ;;  %s1288_s9 = smov 0   ;;  %s1290_s10 = smov 0  }
   0x2   :  { %s1292_s11 = smov 0   ;;  %s1294_s12 = smov 0  }
   0x3 LB: > { %s1309_s13 = sadd.s32 4294967295, %s1266_s12   ;;  %s1044_s14 = sadd.s32 4294967294, %s1266_s12   ;;  %s1266_s12 = sphi %s1294_s12, %s1824_s12   ;;  %s1262_s11 = sphi %s1292_s11, %s1823_s11   ;;  %s1258_s10 = sphi %s1290_s10, %s1822_s10   ;;  %s1254_s9 = sphi %s1288_s9, %s1821_s9  }
   0x4   : > { %s1313_s15 = sadd.s32 1, %s1266_s12   ;;  %s69_s16 = sadd.s32 1, %s1262_s11 }
   0x5   : > { %s66_s17 = ssub.s32 %s1266_s12, %s1313_s15  ;;  %p79_p0 = scmp.ne.s32.totalorder %s1262_s11, %s1258_s10 }
   0x6   : > { %p67_p1 = scmp.eq.s32.totalorder %s66_s17, 0  ;;  %p80_p2 = scmp.eq.s32.totalorder %s1309_s13, 1 }
   0x7   : > { %p85_p3 = scmp.ne.s32.totalorder %s1258_s10, %s1254_s9  ;;  %p86_p4 = scmp.eq.s32.totalorder %s1044_s14, 1 }
   0x8   : > { %s1324_s18 = scalar_select %p67_p1, %s1262_s11, %s69_s16  }
   0x9   : > { %p1326_p5 = por %p80_p2, %p79_p0  ;;  %p1330_p6 = por %p86_p4, %p85_p3 }
   0xa   : > { %p1047_p7 = scmp.ge.s32.totalorder %s1266_s12, 1  ;;  %p116_p8 = scmp.lt.s32.totalorder %s1266_s12, 3 }
   0xc   : > { %p117_p9 = pnand %p1047_p7, %p116_p8 }
   0xd   : > { %v160_v0 = vld [vmem:[%s1815_s1 + $0x8] sm:$0xff] (!%p117_p9)  ;;  %v162_v2 = vld [vmem:[%s1815_s1 + $0x18] sm:$0xff] (!%p117_p9)  ;;  %vm234_vm0 = vcmask (!%p117_p9), 1043456   ;;  %v159_v5 = vld [vmem:[%s1815_s1] sm:$0xff] (!%p117_p9)  ;;  %v1268_v7 = vmov (!%p117_p9), 0.0   ;;  %s138_s5 = smul.u32 (!%p117_p9), 14, %s1309_s13 }
   0xe   : > { %120 = sbr.rel (%p117_p9) target bundleno = 362 (0x16a), region = 28  ;;  %v168_v1 = vld [vmem:[%s1815_s1 + $0x48] sm:$0xff] (!%p117_p9)  ;;  %v170_v4 = vld [vmem:[%s1815_s1 + $0x58] sm:$0xff] (!%p117_p9)  ;;  %v167_v6 = vld [vmem:[%s1815_s1 + $0x40] sm:$0xff] (!%p117_p9)  ;;  %323 = vmatprep.mubr.f32.mxu0 (!%p117_p9), %v1268_v7  ;;  %472 = vmatprep.mubr.f32.mxu1 (!%p117_p9), %v1268_v7  ;;  %vm1269_vm1 = vmmov (!%p117_p9), 1   ;;  %vm191_vm3 = vcmask (!%p117_p9), 228352  }
   0xf   : > { %v1120_v3 = vpack.c.bf16 (!%p117_p9), %v168_v1, %v160_v0  ;;  %v1130_v8 = vpack.c.bf16 (!%p117_p9), %v170_v4, %v162_v2  ;;  %v1122_v9 = vpack.c.bf16 (!%p117_p9), %v167_v6, %v159_v5  ;;  %v161_v10 = vld [vmem:[%s1815_s1 + $0x10] sm:$0xff] (!%p117_p9)  ;;  %v176_v12 = vld [vmem:[%s1815_s1 + $0x88] sm:$0xff] (!%p117_p9)  ;;  %vm1370_vm2 = vmpackc.low (!%p117_p9), %vm234_vm0, %vm1269_vm1  ;;  %p139_p10 = scmp.lt.s32.totalorder (!%p117_p9), %s138_s5, 27  ;;  %s1119_s14 = smul.u32 (!%p117_p9), 14336, %s1309_s13 }
  0x10   : > { %v169_v11 = vld [vmem:[%s1815_s1 + $0x50] sm:$0xff] (!%p117_p9)  ;;  %v184_v14 = vld [vmem:[%s1815_s1 + $0xc8] sm:$0xf] (!%p117_p9)  ;;  %v178_v16 = vld [vmem:[%s1815_s1 + $0x98] sm:$0xff] (!%p117_p9)  ;;  %s1270_s24 = smov (!%p117_p9), [#allocation2]  }
  0x11   : > { %1121 = vmatprep.subr.bf16.mxu0 (!%p117_p9), %v1120_v3  ;;  %v1132_v13 = vpack.c.bf16 (!%p117_p9), %v169_v11, %v161_v10  ;;  %1131 = vmatprep.subr.bf16.mxu1 (!%p117_p9), %v1130_v8  ;;  %v1124_v17 = vpack.c.bf16 (!%p117_p9), %v184_v14, %v176_v12  ;;  %v186_v18 = vld [vmem:[%s1815_s1 + $0xd8] sm:$0xf] (!%p117_p9)  ;;  %v175_v19 = vld [vmem:[%s1815_s1 + $0x80] sm:$0xff] (!%p117_p9)  ;;  %v177_v23 = vld [vmem:[%s1815_s1 + $0x90] sm:$0xff] (!%p117_p9)  ;;  %s1763_s22 = scalar_lea.hbm (!%p117_p9), %s1816_s2, %s1119_s14 }
  0x12   : > { %1123 = vmatpush1.bf16.msra.mxu0 (!%p117_p9), %v1122_v9  ;;  %v183_v20 = vld [vmem:[%s1815_s1 + $0xc0] sm:$0xf] (!%p117_p9)  ;;  %v1134_v21 = vpack.c.bf16 (!%p117_p9), %v186_v18, %v178_v16  ;;  %v185_v24 = vld [vmem:[%s1815_s1 + $0xd0] sm:$0xf] (!%p117_p9)  ;;  %v164_v25 = vld [vmem:[%s1815_s1 + $0x28] sm:$0xff] (!%p117_p9) }
  0x13   : > { %1133 = vmatpush1.bf16.msra.mxu1 (!%p117_p9), %v1132_v13  ;;  %v1127_v22 = vpack.c.bf16 (!%p117_p9), %v183_v20, %v175_v19  ;;  %1126 = vmatprep.subr.msk.bf16.mxu0 (!%p117_p9), %vm1370_vm2, %v1124_v17  ;;  %v1137_v26 = vpack.c.bf16 (!%p117_p9), %v185_v24, %v177_v23  ;;  %v172_v27 = vld [vmem:[%s1815_s1 + $0x68] sm:$0xff] (!%p117_p9)  ;;  %v166_v28 = vld [vmem:[%s1815_s1 + $0x38] sm:$0xff] (!%p117_p9)  ;;  %v163_v32 = vld [vmem:[%s1815_s1 + $0x20] sm:$0xff] (!%p117_p9) }
  0x14   : > { %v174_v29 = vld [vmem:[%s1815_s1 + $0x78] sm:$0xff] (!%p117_p9)  ;;  %1136 = vmatprep.subr.msk.bf16.mxu1 (!%p117_p9), %vm1370_vm2, %v1134_v21  ;;  %v1140_v30 = vpack.c.bf16 (!%p117_p9), %v172_v27, %v164_v25  ;;  %v171_v33 = vld [vmem:[%s1815_s1 + $0x60] sm:$0xff] (!%p117_p9)  ;;  %v165_v34 = vld [vmem:[%s1815_s1 + $0x30] sm:$0xff] (!%p117_p9) }
  0x15   : > { %s1826_s5 = smov (!%p139_p10, %s138_s5), 27  ;;  %v1150_v31 = vpack.c.bf16 %v174_v29, %v166_v28  ;;  %v1142_v35 = vpack.c.bf16 %v171_v33, %v163_v32  ;;  %v173_v36 = vld [vmem:[%s1815_s1 + $0x70] sm:$0xff]  ;;  %v180_v37 = vld [vmem:[%s1815_s1 + $0xa8] sm:$0xff]  ;;  %v182_v43 = vld [vmem:[%s1815_s1 + $0xb8] sm:$0xff] }
  0x16   : > { %s1048_s25 = sshll.u32 %s1826_s5, 3  ;;  %1129 = vmatpush1.bf16.msk.msra.mxu0 %vm1370_vm2, %v1127_v22  ;;  %v188_v38 = vld [vmem:[%s1815_s1 + $0xe8] sm:$0xf]  ;;  %v1152_v40 = vpack.c.bf16 %v173_v36, %v165_v34  ;;  %v190_v44 = vld [vmem:[%s1815_s1 + $0xf8] sm:$0xf]  ;;  %v179_v45 = vld [vmem:[%s1815_s1 + $0xa0] sm:$0xff] }
  0x17   : > { %s1422_s5 = scalar_lea.vmem %s1814_s0, %s1048_s25  ;;  %1139 = vmatpush1.bf16.msk.msra.mxu1 %vm1370_vm2, %v1137_v26  ;;  %1141 = vmatprep.subr.bf16.mxu0 %v1140_v30  ;;  %v1144_v41 = vpack.c.bf16 %v188_v38, %v180_v37  ;;  %v187_v46 = vld [vmem:[%s1815_s1 + $0xe0] sm:$0xf]  ;;  %v1154_v47 = vpack.c.bf16 %v190_v44, %v182_v43  ;;  %v181_v49 = vld [vmem:[%s1815_s1 + $0xb0] sm:$0xff]  ;;  %s1208_s25 = sshll.u32 %s1270_s24, 4  ;;  %s1209_s25 = int_to_ptr.vmem [resolvable:$false] %s1208_s25 }
  0x18   : > { %v1436_v39 = vld [vmem:[%s1422_s5] sm:$0xff]  ;;  %1151 = vmatprep.subr.bf16.mxu1 %v1150_v31  ;;  %v1441_v42 = vld [vmem:[%s1422_s5 + $0x8] sm:$0xff]  ;;  %v1147_v48 = vpack.c.bf16 %v187_v46, %v179_v45  ;;  %v189_v50 = vld [vmem:[%s1815_s1 + $0xf0] sm:$0xf]  ;;  %s1210_s26 = scalar_lea.vmem %s1209_s25, 28672 }
  0x19   : > { %1051 = vmatmul.mubr.msk.f32.vlgmr.msra.gmra.mrb[0].mxu0 %vm191_vm3, %v1436_v39  ;;  %v1157_v51 = vpack.c.bf16 %v189_v50, %v181_v49  ;;  %v1475_v52 = vld [vmem:[%s1422_s5 + $0x10] sm:$0xff]  ;;  %v1488_v53 = vld [vmem:[%s1422_s5 + $0x18] sm:$0xff]  ;;  %v1497_v54 = vld [vmem:[%s1422_s5 + $0x20] sm:$0xff] }
  0x1a   : > { %1067 = vmatmul.mubr.msk.f32.vlgmr.msra.gmra.mrb[0].mxu1 %vm191_vm3, %v1436_v39  ;;  %1143 = vmatpush1.bf16.msra.mxu0 %v1142_v35  ;;  %v1506_v55 = vld [vmem:[%s1422_s5 + $0x28] sm:$0xff]  ;;  %v1515_v56 = vld [vmem:[%s1422_s5 + $0x30] sm:$0xff]  ;;  %v1524_v57 = vld [vmem:[%s1422_s5 + $0x38] sm:$0xff] }
  0x1b   : > { %1153 = vmatpush1.bf16.msra.mxu1 %v1152_v40  ;;  %329 = vmatprep.mubr.f32.mxu0 %v1268_v7  ;;  %v1533_v58 = vld [vmem:[%s1422_s5 + $0x40] sm:$0xff]  ;;  %v1542_v59 = vld [vmem:[%s1422_s5 + $0x48] sm:$0xff]  ;;  %v155_v60 = vld [vmem:[%s1422_s5 + $0x50] sm:$0xff] }
  0x1c   : > { %478 = vmatprep.mubr.f32.mxu1 %v1268_v7  ;;  %1146 = vmatprep.subr.msk.bf16.mxu0 %vm1370_vm2, %v1144_v41  ;;  %v156_v61 = vld [vmem:[%s1422_s5 + $0x58] sm:$0xff]  ;;  %v157_v62 = vld [vmem:[%s1422_s5 + $0x60] sm:$0xff]  ;;  %v158_v63 = vld [vmem:[%s1422_s5 + $0x68] sm:$0xff]  ;;  %s135_s5 = sand.u32 1, %s1258_s10  }
  0x1d   : > { %1052 = vmatmul.mubr.msk.f32.gmra.mrb[2].mxu0 %vm191_vm3, %v1441_v42  ;;  %1156 = vmatprep.subr.msk.bf16.mxu1 %vm1370_vm2, %v1154_v47  ;;  %s1160_s7 = smul.u32 896, %s135_s5  ;;  %s1773_s13 = scalar_lea.sflag [#allocation3], %s135_s5 }
  0x1e   : > { %1068 = vmatmul.mubr.msk.f32.gmra.mrb[2].mxu1 %vm191_vm3, %v1441_v42  ;;  %335 = vmatprep.mubr.f32.mxu0 %v1268_v7 }
  0x1f   : > { %484 = vmatprep.mubr.f32.mxu1 %v1268_v7  ;;  %1149 = vmatpush1.bf16.msk.msra.mxu0 %vm1370_vm2, %v1147_v48  ;;  %s1648_s8 = scalar_lea.vmem [#allocation2], %s1160_s7 }
  0x20   : > { %1159 = vmatpush1.bf16.msk.msra.mxu1 %vm1370_vm2, %v1157_v51  ;;  %s982_s16 = sshll.u32 %s1648_s8, 4  ;;  %s1765_s16 = int_to_ptr.vmem [resolvable:$true] %s982_s16 }
  0x21   : > { %1053 = vmatmul.mubr.msk.f32.gmra.mrb[4].mxu0 %vm191_vm3, %v1475_v52  ;;  %s1204_s23 = scalar_lea.vmem %s1765_s16, 14336  ;;  %p1211_p0 = scmp.lt.s32.totalorder %s1765_s16, %s1209_s25 }
  0x22   : > { %1069 = vmatmul.mubr.msk.f32.gmra.mrb[4].mxu1 %vm191_vm3, %v1475_v52  ;;  %341 = vmatprep.mubr.f32.mxu0 %v1268_v7  ;;  %p1205_p11 = scmp.ne.s32.totalorder %s1765_s16, %s1204_s23  ;;  %p1212_p1 = scmp.lt.s32.totalorder %s1210_s26, %s1204_s23 }
  0x23   : > { %490 = vmatprep.mubr.f32.mxu1 %v1268_v7 }
  0x24   : > { %p1206_p12 = pnand %p1205_p11, %p1326_p5  ;;  %p1213_p2 = por %p1212_p1, %p1211_p0 }
  0x25   : > { %1054 = vmatmul.mubr.msk.f32.gmra.mrb[6].mxu0 %vm191_vm3, %v1488_v53 }
  0x26   : > { %1070 = vmatmul.mubr.msk.f32.gmra.mrb[6].mxu1 %vm191_vm3, %v1488_v53  ;;  %347 = vmatprep.mubr.f32.mxu0 %v1268_v7  ;;  %p1207_p13 = pneg %p1206_p12 }
  0x27   : > { %496 = vmatprep.mubr.f32.mxu1 %v1268_v7 }
  0x28   : > { %p1214_p3 = pnand %p1213_p2, %p1207_p13 }
  0x29   : > { %1055 = vmatmul.mubr.msk.f32.gmra.mrb[8].mxu0 %vm191_vm3, %v1497_v54 }
  0x2a   : > { %1071 = vmatmul.mubr.msk.f32.gmra.mrb[8].mxu1 %vm191_vm3, %v1497_v54  ;;  %353 = vmatprep.mubr.f32.mxu0 %v1268_v7 }
  0x2b   : > { %502 = vmatprep.mubr.f32.mxu1 %v1268_v7 }
  0x2d   : > { %1056 = vmatmul.mubr.msk.f32.gmra.mrb[10].mxu0 %vm191_vm3, %v1506_v55 }
  0x2e   : > { %1072 = vmatmul.mubr.msk.f32.gmra.mrb[10].mxu1 %vm191_vm3, %v1506_v55  ;;  %359 = vmatprep.mubr.f32.mxu0 %v1268_v7 }
  0x2f   : > { %508 = vmatprep.mubr.f32.mxu1 %v1268_v7 }
  0x31   : > { %1057 = vmatmul.mubr.msk.f32.gmra.mrb[12].mxu0 %vm191_vm3, %v1515_v56 }
  0x32   : > { %1073 = vmatmul.mubr.msk.f32.gmra.mrb[12].mxu1 %vm191_vm3, %v1515_v56  ;;  %365 = vmatprep.mubr.f32.mxu0 %v1268_v7 }
  0x33   : > { %514 = vmatprep.mubr.f32.mxu1 %v1268_v7 }
  0x35   : > { %1058 = vmatmul.mubr.msk.f32.gmra.mrb[14].mxu0 %vm191_vm3, %v1524_v57 }
  0x36   : > { %1074 = vmatmul.mubr.msk.f32.gmra.mrb[14].mxu1 %vm191_vm3, %v1524_v57  ;;  %371 = vmatprep.mubr.f32.mxu0 %v1268_v7 }
  0x37   : > { %520 = vmatprep.mubr.f32.mxu1 %v1268_v7 }
  0x39   : > { %1059 = vmatmul.mubr.msk.f32.gmra.mrb[16].mxu0 %vm191_vm3, %v1533_v58 }
  0x3a   : > { %1075 = vmatmul.mubr.msk.f32.gmra.mrb[16].mxu1 %vm191_vm3, %v1533_v58  ;;  %377 = vmatprep.mubr.f32.mxu0 %v1268_v7 }
  0x3b   : > { %526 = vmatprep.mubr.f32.mxu1 %v1268_v7 }
  0x3d   : > { %1060 = vmatmul.mubr.msk.f32.gmra.mrb[18].mxu0 %vm191_vm3, %v1542_v59 }
  0x3e   : > { %1076 = vmatmul.mubr.msk.f32.gmra.mrb[18].mxu1 %vm191_vm3, %v1542_v59  ;;  %383 = vmatprep.mubr.f32.mxu0 %v1268_v7 }
  0x3f   : > { %532 = vmatprep.mubr.f32.mxu1 %v1268_v7 }
  0x41   : > { %1061 = vmatmul.mubr.msk.f32.gmra.mrb[20].mxu0 %vm191_vm3, %v155_v60 }
  0x42   : > { %1077 = vmatmul.mubr.msk.f32.gmra.mrb[20].mxu1 %vm191_vm3, %v155_v60  ;;  %389 = vmatprep.mubr.f32.mxu0 %v1268_v7 }
  0x43   : > { %538 = vmatprep.mubr.f32.mxu1 %v1268_v7 }
  0x45   : > { %1062 = vmatmul.mubr.msk.f32.gmra.mrb[22].mxu0 %vm191_vm3, %v156_v61 }
  0x46   : > { %1078 = vmatmul.mubr.msk.f32.gmra.mrb[22].mxu1 %vm191_vm3, %v156_v61  ;;  %395 = vmatprep.mubr.f32.mxu0 %v1268_v7 }
  0x47   : > { %544 = vmatprep.mubr.f32.mxu1 %v1268_v7 }
  0x49   : > { %1063 = vmatmul.mubr.msk.f32.gmra.mrb[24].mxu0 %vm191_vm3, %v157_v62 }
  0x4a   : > { %1079 = vmatmul.mubr.msk.f32.gmra.mrb[24].mxu1 %vm191_vm3, %v157_v62  ;;  %401 = vmatprep.mubr.f32.mxu0 %v1268_v7 }
  0x4b   : > { %550 = vmatprep.mubr.f32.mxu1 %v1268_v7 }
  0x4d   : > { %1064 = vmatmul.mubr.msk.f32.gmra.mrb[26].mxu0 %vm191_vm3, %v158_v63 }
  0x4e   : > { %1080 = vmatmul.mubr.msk.f32.gmra.mrb[26].mxu1 %vm191_vm3, %v158_v63  ;;  %621 = vmatprep.mubr.f32.mxu0 %v1268_v7 }
  0x4f   : > { %770 = vmatprep.mubr.f32.mxu1 %v1268_v7 }
  0x51   : > { %1083 = vmatmul.mubr.msk.f32.vlgmr.msra.gmra.mrb[28].mxu0 %vm191_vm3, %v1436_v39 }
  0x52   : > { %1099 = vmatmul.mubr.msk.f32.vlgmr.msra.gmra.mrb[28].mxu1 %vm191_vm3, %v1436_v39  ;;  %627 = vmatprep.mubr.f32.mxu0 %v1268_v7 }
  0x53   : > { %776 = vmatprep.mubr.f32.mxu1 %v1268_v7 }
  0x55   : > { %1084 = vmatmul.mubr.msk.f32.gmra.mrb[30].mxu0 %vm191_vm3, %v1441_v42 }
  0x56   : > { %1100 = vmatmul.mubr.msk.f32.gmra.mrb[30].mxu1 %vm191_vm3, %v1441_v42  ;;  %633 = vmatprep.mubr.f32.mxu0 %v1268_v7 }
  0x57   : > { %782 = vmatprep.mubr.f32.mxu1 %v1268_v7 }
  0x59   : > { %1085 = vmatmul.mubr.msk.f32.gmra.mrb[32].mxu0 %vm191_vm3, %v1475_v52 }
  0x5a   : > { %1101 = vmatmul.mubr.msk.f32.gmra.mrb[32].mxu1 %vm191_vm3, %v1475_v52  ;;  %639 = vmatprep.mubr.f32.mxu0 %v1268_v7 }
  0x5b   : > { %788 = vmatprep.mubr.f32.mxu1 %v1268_v7 }
  0x5d   : > { %1086 = vmatmul.mubr.msk.f32.gmra.mrb[34].mxu0 %vm191_vm3, %v1488_v53 }
  0x5e   : > { %1102 = vmatmul.mubr.msk.f32.gmra.mrb[34].mxu1 %vm191_vm3, %v1488_v53  ;;  %645 = vmatprep.mubr.f32.mxu0 %v1268_v7 }
  0x5f   : > { %794 = vmatprep.mubr.f32.mxu1 %v1268_v7 }
  0x61   : > { %1087 = vmatmul.mubr.msk.f32.gmra.mrb[36].mxu0 %vm191_vm3, %v1497_v54 }
  0x62   : > { %1103 = vmatmul.mubr.msk.f32.gmra.mrb[36].mxu1 %vm191_vm3, %v1497_v54  ;;  %651 = vmatprep.mubr.f32.mxu0 %v1268_v7 }
  0x63   : > { %800 = vmatprep.mubr.f32.mxu1 %v1268_v7 }
  0x65   : > { %1088 = vmatmul.mubr.msk.f32.gmra.mrb[38].mxu0 %vm191_vm3, %v1506_v55 }
  0x66   : > { %1104 = vmatmul.mubr.msk.f32.gmra.mrb[38].mxu1 %vm191_vm3, %v1506_v55  ;;  %657 = vmatprep.mubr.f32.mxu0 %v1268_v7 }
  0x67   : > { %806 = vmatprep.mubr.f32.mxu1 %v1268_v7 }
  0x69   : > { %1089 = vmatmul.mubr.msk.f32.gmra.mrb[40].mxu0 %vm191_vm3, %v1515_v56 }
  0x6a   : > { %1105 = vmatmul.mubr.msk.f32.gmra.mrb[40].mxu1 %vm191_vm3, %v1515_v56  ;;  %663 = vmatprep.mubr.f32.mxu0 %v1268_v7 }
  0x6b   : > { %812 = vmatprep.mubr.f32.mxu1 %v1268_v7 }
  0x6d   : > { %1090 = vmatmul.mubr.msk.f32.gmra.mrb[42].mxu0 %vm191_vm3, %v1524_v57 }
  0x6e   : > { %1106 = vmatmul.mubr.msk.f32.gmra.mrb[42].mxu1 %vm191_vm3, %v1524_v57  ;;  %669 = vmatprep.mubr.f32.mxu0 %v1268_v7 }
  0x6f   : > { %818 = vmatprep.mubr.f32.mxu1 %v1268_v7 }
  0x71   : > { %1091 = vmatmul.mubr.msk.f32.gmra.mrb[44].mxu0 %vm191_vm3, %v1533_v58 }
  0x72   : > { %1107 = vmatmul.mubr.msk.f32.gmra.mrb[44].mxu1 %vm191_vm3, %v1533_v58  ;;  %675 = vmatprep.mubr.f32.mxu0 %v1268_v7 }
  0x73   : > { %824 = vmatprep.mubr.f32.mxu1 %v1268_v7 }
  0x75   : > { %1092 = vmatmul.mubr.msk.f32.gmra.mrb[46].mxu0 %vm191_vm3, %v1542_v59 }
  0x76   : > { %1108 = vmatmul.mubr.msk.f32.gmra.mrb[46].mxu1 %vm191_vm3, %v1542_v59  ;;  %681 = vmatprep.mubr.f32.mxu0 %v1268_v7 }
  0x77   : > { %830 = vmatprep.mubr.f32.mxu1 %v1268_v7 }
  0x79   : > { %1093 = vmatmul.mubr.msk.f32.gmra.mrb[48].mxu0 %vm191_vm3, %v155_v60 }
  0x7a   : > { %1109 = vmatmul.mubr.msk.f32.gmra.mrb[48].mxu1 %vm191_vm3, %v155_v60  ;;  %687 = vmatprep.mubr.f32.mxu0 %v1268_v7 }
  0x7b   : > { %836 = vmatprep.mubr.f32.mxu1 %v1268_v7 }
  0x7d   : > { %1094 = vmatmul.mubr.msk.f32.gmra.mrb[50].mxu0 %vm191_vm3, %v156_v61 }
  0x7e   : > { %1110 = vmatmul.mubr.msk.f32.gmra.mrb[50].mxu1 %vm191_vm3, %v156_v61  ;;  %693 = vmatprep.mubr.f32.mxu0 %v1268_v7 }
  0x7f   : > { %842 = vmatprep.mubr.f32.mxu1 %v1268_v7 }
  0x81   : > { %1095 = vmatmul.mubr.msk.f32.gmra.mrb[52].mxu0 %vm191_vm3, %v157_v62 }
  0x82   : > { %1111 = vmatmul.mubr.msk.f32.gmra.mrb[52].mxu1 %vm191_vm3, %v157_v62  ;;  %699 = vmatprep.mubr.f32.mxu0 %v1268_v7 }
  0x83   : > { %848 = vmatprep.mubr.f32.mxu1 %v1268_v7 }
  0x85   : > { %1096 = vmatmul.mubr.msk.f32.gmra.mrb[54].mxu0 %vm191_vm3, %v158_v63 }
  0x86   : > { %1112 = vmatmul.mubr.msk.f32.gmra.mrb[54].mxu1 %vm191_vm3, %v158_v63 }
  0xec   : > { %v325_v0 = vpop.f32.mrb[0].mxu0 }
  0xed   : > { %855 = vst [vmem:[%s1648_s8] sm:$0xff] %v325_v0  ;;  %v474_v1 = vpop.f32.mrb[0].mxu1  ;;  %v327_v2 = vpop.f32.mrb[1].mxu0 }
  0xee   : > { %857 = vst [vmem:[%s1648_s8 + $0x10] sm:$0xff] %v474_v1  ;;  %856 = vst [vmem:[%s1648_s8 + $0x8] sm:$0xff] %v327_v2  ;;  %v476_v3 = vpop.f32.mrb[1].mxu1 }
  0xef   : > { %858 = vst [vmem:[%s1648_s8 + $0x18] sm:$0xff] %v476_v3 }
  0xf0   : > { %v331_v4 = vpop.f32.mrb[2].mxu0 }
  0xf1   : > { %863 = vst [vmem:[%s1648_s8 + $0x40] sm:$0xff] %v331_v4  ;;  %v480_v5 = vpop.f32.mrb[2].mxu1  ;;  %v333_v6 = vpop.f32.mrb[3].mxu0 }
  0xf2   : > { %865 = vst [vmem:[%s1648_s8 + $0x50] sm:$0xff] %v480_v5  ;;  %864 = vst [vmem:[%s1648_s8 + $0x48] sm:$0xff] %v333_v6  ;;  %v482_v7 = vpop.f32.mrb[3].mxu1 }
  0xf3   : > { %866 = vst [vmem:[%s1648_s8 + $0x58] sm:$0xff] %v482_v7 }
  0xf4   : > { %v337_v8 = vpop.f32.mrb[4].mxu0 }
  0xf5   : > { %871 = vst [vmem:[%s1648_s8 + $0x80] sm:$0xff] %v337_v8  ;;  %v486_v9 = vpop.f32.mrb[4].mxu1  ;;  %v339_v10 = vpop.f32.mrb[5].mxu0 }
  0xf6   : > { %873 = vst [vmem:[%s1648_s8 + $0x90] sm:$0xff] %v486_v9  ;;  %872 = vst [vmem:[%s1648_s8 + $0x88] sm:$0xff] %v339_v10  ;;  %v488_v11 = vpop.f32.mrb[5].mxu1 }
  0xf7   : > { %874 = vst [vmem:[%s1648_s8 + $0x98] sm:$0xff] %v488_v11 }
  0xf8   : > { %v343_v12 = vpop.f32.mrb[6].mxu0 }
  0xf9   : > { %879 = vst [vmem:[%s1648_s8 + $0xc0] sm:$0xff] %v343_v12  ;;  %v492_v13 = vpop.f32.mrb[6].mxu1  ;;  %v345_v14 = vpop.f32.mrb[7].mxu0 }
  0xfa   : > { %881 = vst [vmem:[%s1648_s8 + $0xd0] sm:$0xff] %v492_v13  ;;  %880 = vst [vmem:[%s1648_s8 + $0xc8] sm:$0xff] %v345_v14  ;;  %v494_v15 = vpop.f32.mrb[7].mxu1 }
  0xfb   : > { %882 = vst [vmem:[%s1648_s8 + $0xd8] sm:$0xff] %v494_v15 }
  0xfc   : > { %v349_v16 = vpop.f32.mrb[8].mxu0 }
  0xfd   : > { %887 = vst [vmem:[%s1648_s8 + $0x100] sm:$0xff] %v349_v16  ;;  %v498_v17 = vpop.f32.mrb[8].mxu1  ;;  %v351_v18 = vpop.f32.mrb[9].mxu0 }
  0xfe   : > { %889 = vst [vmem:[%s1648_s8 + $0x110] sm:$0xff] %v498_v17  ;;  %888 = vst [vmem:[%s1648_s8 + $0x108] sm:$0xff] %v351_v18  ;;  %v500_v19 = vpop.f32.mrb[9].mxu1 }
  0xff   : > { %890 = vst [vmem:[%s1648_s8 + $0x118] sm:$0xff] %v500_v19 }
 0x100   : > { %v355_v20 = vpop.f32.mrb[10].mxu0 }
 0x101   : > { %895 = vst [vmem:[%s1648_s8 + $0x140] sm:$0xff] %v355_v20  ;;  %v504_v21 = vpop.f32.mrb[10].mxu1  ;;  %v357_v22 = vpop.f32.mrb[11].mxu0 }
 0x102   : > { %897 = vst [vmem:[%s1648_s8 + $0x150] sm:$0xff] %v504_v21  ;;  %896 = vst [vmem:[%s1648_s8 + $0x148] sm:$0xff] %v357_v22  ;;  %v506_v23 = vpop.f32.mrb[11].mxu1 }
 0x103   : > { %898 = vst [vmem:[%s1648_s8 + $0x158] sm:$0xff] %v506_v23 }
 0x104   : > { %v361_v24 = vpop.f32.mrb[12].mxu0 }
 0x105   : > { %903 = vst [vmem:[%s1648_s8 + $0x180] sm:$0xff] %v361_v24  ;;  %v510_v25 = vpop.f32.mrb[12].mxu1  ;;  %v363_v26 = vpop.f32.mrb[13].mxu0 }
 0x106   : > { %905 = vst [vmem:[%s1648_s8 + $0x190] sm:$0xff] %v510_v25  ;;  %904 = vst [vmem:[%s1648_s8 + $0x188] sm:$0xff] %v363_v26  ;;  %v512_v27 = vpop.f32.mrb[13].mxu1 }
 0x107   : > { %906 = vst [vmem:[%s1648_s8 + $0x198] sm:$0xff] %v512_v27 }
 0x108   : > { %v367_v28 = vpop.f32.mrb[14].mxu0 }
 0x109   : > { %911 = vst [vmem:[%s1648_s8 + $0x1c0] sm:$0xff] %v367_v28  ;;  %v516_v29 = vpop.f32.mrb[14].mxu1  ;;  %v369_v30 = vpop.f32.mrb[15].mxu0 }
 0x10a   : > { %913 = vst [vmem:[%s1648_s8 + $0x1d0] sm:$0xff] %v516_v29  ;;  %912 = vst [vmem:[%s1648_s8 + $0x1c8] sm:$0xff] %v369_v30  ;;  %v518_v31 = vpop.f32.mrb[15].mxu1 }
 0x10b   : > { %914 = vst [vmem:[%s1648_s8 + $0x1d8] sm:$0xff] %v518_v31 }
 0x10c   : > { %v373_v32 = vpop.f32.mrb[16].mxu0 }
 0x10d   : > { %919 = vst [vmem:[%s1648_s8 + $0x200] sm:$0xff] %v373_v32  ;;  %v522_v33 = vpop.f32.mrb[16].mxu1  ;;  %v375_v34 = vpop.f32.mrb[17].mxu0 }
 0x10e   : > { %921 = vst [vmem:[%s1648_s8 + $0x210] sm:$0xff] %v522_v33  ;;  %920 = vst [vmem:[%s1648_s8 + $0x208] sm:$0xff] %v375_v34  ;;  %v524_v35 = vpop.f32.mrb[17].mxu1 }
 0x10f   : > { %922 = vst [vmem:[%s1648_s8 + $0x218] sm:$0xff] %v524_v35 }
 0x110   : > { %v379_v36 = vpop.f32.mrb[18].mxu0 }
 0x111   : > { %927 = vst [vmem:[%s1648_s8 + $0x240] sm:$0xff] %v379_v36  ;;  %v528_v37 = vpop.f32.mrb[18].mxu1  ;;  %v381_v38 = vpop.f32.mrb[19].mxu0 }
 0x112   : > { %929 = vst [vmem:[%s1648_s8 + $0x250] sm:$0xff] %v528_v37  ;;  %928 = vst [vmem:[%s1648_s8 + $0x248] sm:$0xff] %v381_v38  ;;  %v530_v39 = vpop.f32.mrb[19].mxu1 }
 0x113   : > { %930 = vst [vmem:[%s1648_s8 + $0x258] sm:$0xff] %v530_v39 }
 0x114   : > { %v385_v40 = vpop.f32.mrb[20].mxu0 }
 0x115   : > { %935 = vst [vmem:[%s1648_s8 + $0x280] sm:$0xff] %v385_v40  ;;  %v534_v41 = vpop.f32.mrb[20].mxu1  ;;  %v387_v42 = vpop.f32.mrb[21].mxu0 }
 0x116   : > { %937 = vst [vmem:[%s1648_s8 + $0x290] sm:$0xff] %v534_v41  ;;  %936 = vst [vmem:[%s1648_s8 + $0x288] sm:$0xff] %v387_v42  ;;  %v536_v43 = vpop.f32.mrb[21].mxu1 }
 0x117   : > { %938 = vst [vmem:[%s1648_s8 + $0x298] sm:$0xff] %v536_v43 }
 0x118   : > { %v391_v44 = vpop.f32.mrb[22].mxu0 }
 0x119   : > { %943 = vst [vmem:[%s1648_s8 + $0x2c0] sm:$0xff] %v391_v44  ;;  %v540_v45 = vpop.f32.mrb[22].mxu1  ;;  %v393_v46 = vpop.f32.mrb[23].mxu0 }
 0x11a   : > { %945 = vst [vmem:[%s1648_s8 + $0x2d0] sm:$0xff] %v540_v45  ;;  %944 = vst [vmem:[%s1648_s8 + $0x2c8] sm:$0xff] %v393_v46  ;;  %v542_v47 = vpop.f32.mrb[23].mxu1 }
 0x11b   : > { %946 = vst [vmem:[%s1648_s8 + $0x2d8] sm:$0xff] %v542_v47 }
 0x11c   : > { %v397_v48 = vpop.f32.mrb[24].mxu0 }
 0x11d   : > { %951 = vst [vmem:[%s1648_s8 + $0x300] sm:$0xff] %v397_v48  ;;  %v546_v49 = vpop.f32.mrb[24].mxu1  ;;  %v399_v50 = vpop.f32.mrb[25].mxu0 }
 0x11e   : > { %953 = vst [vmem:[%s1648_s8 + $0x310] sm:$0xff] %v546_v49  ;;  %952 = vst [vmem:[%s1648_s8 + $0x308] sm:$0xff] %v399_v50  ;;  %v548_v51 = vpop.f32.mrb[25].mxu1 }
 0x11f   : > { %954 = vst [vmem:[%s1648_s8 + $0x318] sm:$0xff] %v548_v51 }
 0x120   : > { %v403_v52 = vpop.f32.mrb[26].mxu0 }
 0x121   : > { %959 = vst [vmem:[%s1648_s8 + $0x340] sm:$0xff] %v403_v52  ;;  %v552_v53 = vpop.f32.mrb[26].mxu1  ;;  %v405_v54 = vpop.f32.mrb[27].mxu0 }
 0x122   : > { %961 = vst [vmem:[%s1648_s8 + $0x350] sm:$0xff] %v552_v53  ;;  %960 = vst [vmem:[%s1648_s8 + $0x348] sm:$0xff] %v405_v54  ;;  %v554_v55 = vpop.f32.mrb[27].mxu1 }
 0x123   : > { %962 = vst [vmem:[%s1648_s8 + $0x358] sm:$0xff] %v554_v55 }
 0x124   : > { %v623_v56 = vpop.f32.mrb[28].mxu0 }
 0x125   : > { %859 = vst [vmem:[%s1648_s8 + $0x20] sm:$0xff] %v623_v56  ;;  %v772_v57 = vpop.f32.mrb[28].mxu1  ;;  %v625_v58 = vpop.f32.mrb[29].mxu0 }
 0x126   : > { %861 = vst [vmem:[%s1648_s8 + $0x30] sm:$0xff] %v772_v57  ;;  %860 = vst [vmem:[%s1648_s8 + $0x28] sm:$0xff] %v625_v58  ;;  %v774_v59 = vpop.f32.mrb[29].mxu1 }
 0x127   : > { %862 = vst [vmem:[%s1648_s8 + $0x38] sm:$0xff] %v774_v59 }
 0x128   : > { %v629_v60 = vpop.f32.mrb[30].mxu0 }
 0x129   : > { %867 = vst [vmem:[%s1648_s8 + $0x60] sm:$0xff] %v629_v60  ;;  %v778_v61 = vpop.f32.mrb[30].mxu1  ;;  %v631_v62 = vpop.f32.mrb[31].mxu0 }
 0x12a   : > { %869 = vst [vmem:[%s1648_s8 + $0x70] sm:$0xff] %v778_v61  ;;  %868 = vst [vmem:[%s1648_s8 + $0x68] sm:$0xff] %v631_v62  ;;  %v780_v63 = vpop.f32.mrb[31].mxu1 }
 0x12b   : > { %870 = vst [vmem:[%s1648_s8 + $0x78] sm:$0xff] %v780_v63 }
 0x12c   : > { %v635_v0 = vpop.f32.mrb[32].mxu0 }
 0x12d   : > { %875 = vst [vmem:[%s1648_s8 + $0xa0] sm:$0xff] %v635_v0  ;;  %v784_v1 = vpop.f32.mrb[32].mxu1  ;;  %v637_v2 = vpop.f32.mrb[33].mxu0 }
 0x12e   : > { %877 = vst [vmem:[%s1648_s8 + $0xb0] sm:$0xff] %v784_v1  ;;  %876 = vst [vmem:[%s1648_s8 + $0xa8] sm:$0xff] %v637_v2  ;;  %v786_v3 = vpop.f32.mrb[33].mxu1 }
 0x12f   : > { %878 = vst [vmem:[%s1648_s8 + $0xb8] sm:$0xff] %v786_v3 }
 0x130   : > { %v641_v4 = vpop.f32.mrb[34].mxu0 }
 0x131   : > { %883 = vst [vmem:[%s1648_s8 + $0xe0] sm:$0xff] %v641_v4  ;;  %v790_v5 = vpop.f32.mrb[34].mxu1  ;;  %v643_v6 = vpop.f32.mrb[35].mxu0 }
 0x132   : > { %885 = vst [vmem:[%s1648_s8 + $0xf0] sm:$0xff] %v790_v5  ;;  %884 = vst [vmem:[%s1648_s8 + $0xe8] sm:$0xff] %v643_v6  ;;  %v792_v7 = vpop.f32.mrb[35].mxu1 }
 0x133   : > { %886 = vst [vmem:[%s1648_s8 + $0xf8] sm:$0xff] %v792_v7 }
 0x134   : > { %v647_v8 = vpop.f32.mrb[36].mxu0 }
 0x135   : > { %891 = vst [vmem:[%s1648_s8 + $0x120] sm:$0xff] %v647_v8  ;;  %v796_v9 = vpop.f32.mrb[36].mxu1  ;;  %v649_v10 = vpop.f32.mrb[37].mxu0 }
 0x136   : > { %893 = vst [vmem:[%s1648_s8 + $0x130] sm:$0xff] %v796_v9  ;;  %892 = vst [vmem:[%s1648_s8 + $0x128] sm:$0xff] %v649_v10  ;;  %v798_v11 = vpop.f32.mrb[37].mxu1 }
 0x137   : > { %894 = vst [vmem:[%s1648_s8 + $0x138] sm:$0xff] %v798_v11 }
 0x138   : > { %v653_v12 = vpop.f32.mrb[38].mxu0 }
 0x139   : > { %899 = vst [vmem:[%s1648_s8 + $0x160] sm:$0xff] %v653_v12  ;;  %v802_v13 = vpop.f32.mrb[38].mxu1  ;;  %v655_v14 = vpop.f32.mrb[39].mxu0 }
 0x13a   : > { %901 = vst [vmem:[%s1648_s8 + $0x170] sm:$0xff] %v802_v13  ;;  %900 = vst [vmem:[%s1648_s8 + $0x168] sm:$0xff] %v655_v14  ;;  %v804_v15 = vpop.f32.mrb[39].mxu1 }
 0x13b   : > { %902 = vst [vmem:[%s1648_s8 + $0x178] sm:$0xff] %v804_v15 }
 0x13c   : > { %v659_v16 = vpop.f32.mrb[40].mxu0 }
 0x13d   : > { %907 = vst [vmem:[%s1648_s8 + $0x1a0] sm:$0xff] %v659_v16  ;;  %v808_v17 = vpop.f32.mrb[40].mxu1  ;;  %v661_v18 = vpop.f32.mrb[41].mxu0 }
 0x13e   : > { %909 = vst [vmem:[%s1648_s8 + $0x1b0] sm:$0xff] %v808_v17  ;;  %908 = vst [vmem:[%s1648_s8 + $0x1a8] sm:$0xff] %v661_v18  ;;  %v810_v19 = vpop.f32.mrb[41].mxu1 }
 0x13f   : > { %910 = vst [vmem:[%s1648_s8 + $0x1b8] sm:$0xff] %v810_v19 }
 0x140   : > { %v665_v20 = vpop.f32.mrb[42].mxu0 }
 0x141   : > { %915 = vst [vmem:[%s1648_s8 + $0x1e0] sm:$0xff] %v665_v20  ;;  %v814_v21 = vpop.f32.mrb[42].mxu1  ;;  %v667_v22 = vpop.f32.mrb[43].mxu0 }
 0x142   : > { %917 = vst [vmem:[%s1648_s8 + $0x1f0] sm:$0xff] %v814_v21  ;;  %916 = vst [vmem:[%s1648_s8 + $0x1e8] sm:$0xff] %v667_v22  ;;  %v816_v23 = vpop.f32.mrb[43].mxu1 }
 0x143   : > { %918 = vst [vmem:[%s1648_s8 + $0x1f8] sm:$0xff] %v816_v23 }
 0x144   : > { %v671_v24 = vpop.f32.mrb[44].mxu0 }
 0x145   : > { %923 = vst [vmem:[%s1648_s8 + $0x220] sm:$0xff] %v671_v24  ;;  %v820_v25 = vpop.f32.mrb[44].mxu1  ;;  %v673_v26 = vpop.f32.mrb[45].mxu0 }
 0x146   : > { %925 = vst [vmem:[%s1648_s8 + $0x230] sm:$0xff] %v820_v25  ;;  %924 = vst [vmem:[%s1648_s8 + $0x228] sm:$0xff] %v673_v26  ;;  %v822_v27 = vpop.f32.mrb[45].mxu1 }
 0x147   : > { %926 = vst [vmem:[%s1648_s8 + $0x238] sm:$0xff] %v822_v27 }
 0x148   : > { %v677_v28 = vpop.f32.mrb[46].mxu0 }
 0x149   : > { %931 = vst [vmem:[%s1648_s8 + $0x260] sm:$0xff] %v677_v28  ;;  %v826_v29 = vpop.f32.mrb[46].mxu1  ;;  %v679_v30 = vpop.f32.mrb[47].mxu0 }
 0x14a   : > { %933 = vst [vmem:[%s1648_s8 + $0x270] sm:$0xff] %v826_v29  ;;  %932 = vst [vmem:[%s1648_s8 + $0x268] sm:$0xff] %v679_v30  ;;  %v828_v31 = vpop.f32.mrb[47].mxu1 }
 0x14b   : > { %934 = vst [vmem:[%s1648_s8 + $0x278] sm:$0xff] %v828_v31 }
 0x14c   : > { %v683_v32 = vpop.f32.mrb[48].mxu0 }
 0x14d   : > { %939 = vst [vmem:[%s1648_s8 + $0x2a0] sm:$0xff] %v683_v32  ;;  %v832_v33 = vpop.f32.mrb[48].mxu1  ;;  %v685_v34 = vpop.f32.mrb[49].mxu0 }
 0x14e   : > { %941 = vst [vmem:[%s1648_s8 + $0x2b0] sm:$0xff] %v832_v33  ;;  %940 = vst [vmem:[%s1648_s8 + $0x2a8] sm:$0xff] %v685_v34  ;;  %v834_v35 = vpop.f32.mrb[49].mxu1 }
 0x14f   : > { %942 = vst [vmem:[%s1648_s8 + $0x2b8] sm:$0xff] %v834_v35 }
 0x150   : > { %v689_v36 = vpop.f32.mrb[50].mxu0 }
 0x151   : > { %947 = vst [vmem:[%s1648_s8 + $0x2e0] sm:$0xff] %v689_v36  ;;  %v838_v37 = vpop.f32.mrb[50].mxu1  ;;  %v691_v38 = vpop.f32.mrb[51].mxu0 }
 0x152   : > { %949 = vst [vmem:[%s1648_s8 + $0x2f0] sm:$0xff] %v838_v37  ;;  %948 = vst [vmem:[%s1648_s8 + $0x2e8] sm:$0xff] %v691_v38  ;;  %v840_v39 = vpop.f32.mrb[51].mxu1 }
 0x153   : > { %950 = vst [vmem:[%s1648_s8 + $0x2f8] sm:$0xff] %v840_v39 }
 0x154   : > { %v695_v40 = vpop.f32.mrb[52].mxu0 }
 0x155   : > { %955 = vst [vmem:[%s1648_s8 + $0x320] sm:$0xff] %v695_v40  ;;  %v844_v41 = vpop.f32.mrb[52].mxu1  ;;  %v697_v42 = vpop.f32.mrb[53].mxu0 }
 0x156   : > { %957 = vst [vmem:[%s1648_s8 + $0x330] sm:$0xff] %v844_v41  ;;  %956 = vst [vmem:[%s1648_s8 + $0x328] sm:$0xff] %v697_v42  ;;  %v846_v43 = vpop.f32.mrb[53].mxu1 }
 0x157   : > { %958 = vst [vmem:[%s1648_s8 + $0x338] sm:$0xff] %v846_v43 }
 0x158   : > { %v701_v44 = vpop.f32.mrb[54].mxu0 }
 0x159   : > { %963 = vst [vmem:[%s1648_s8 + $0x360] sm:$0xff] %v701_v44  ;;  %v850_v45 = vpop.f32.mrb[54].mxu1  ;;  %v703_v46 = vpop.f32.mrb[55].mxu0 }
 0x15a   : > { %965 = vst [vmem:[%s1648_s8 + $0x370] sm:$0xff] %v850_v45  ;;  %964 = vst [vmem:[%s1648_s8 + $0x368] sm:$0xff] %v703_v46  ;;  %v852_v47 = vpop.f32.mrb[55].mxu1 }
 0x15b   : > { %966 = vst [vmem:[%s1648_s8 + $0x378] sm:$0xff] %v852_v47 }
 0x15c   : > { %1217 = shalt.err (!%p1214_p3)
}
 0x15d   : > { %s1218_s27 = scalar_lea.hbm %s1763_s22, 14336  ;;  %s1222_s30 = scalar_lea.hbm %s1816_s2, 28672 }
 0x15e   : > { %p1219_p4 = scmp.ne.s32.totalorder %s1763_s22, %s1218_s27  ;;  %p1223_p9 = scmp.lt.u32.totalorder %s1763_s22, %s1816_s2 }
 0x15f   : > { %p1224_p10 = scmp.lt.u32.totalorder %s1222_s30, %s1218_s27  ;;  %p1226_p12 = scmp.lt.u32.totalorder %s1218_s27, %s1763_s22 }
 0x160   : > { %p1220_p7 = pnand %p1219_p4, %p1326_p5 }
 0x161   : > { %p1225_p11 = por %p1224_p10, %p1223_p9 }
 0x162   : > { %p1221_p8 = pneg %p1220_p7 }
 0x163   : > { %p1227_p13 = por %p1226_p12, %p1225_p11 }
 0x165   : > { %p1228_p0 = pnand %p1227_p13, %p1221_p8 }
 0x167   : > { %1231 = shalt.err (!%p1228_p0)
}
 0x168   : > { %s1271_s6 = smov 1024   ;;  %s1272_s5 = smov 64  }
 0x169   : > { %1161 = dma.vmem_to_hbm [thread:$0]  (%p1326_p5), %s1765_s16, 14336, %s1763_s22, %s1773_s13, %s1271_s6, %s1271_s6, %s1272_s5  }
 0x16a PF: > { %p1167_p1 = scmp.ge.s32.totalorder %s1266_s12, 2  ;;  %s997_s7 = sand.u32 1, %s1254_s9  }
 0x16b   : > { %s998_s8 = scalar_lea.sflag [#allocation3], %s997_s7 }
 0x16c   : > { %p1164_p2 = pnand %p1167_p1, %p1330_p6 }
 0x16e   : > { %1249 = dma.done.wait (!%p1164_p2), %s998_s8, 14336  }
 0x16f   : > { %1251 = vsyncadd (!%p1164_p2), %s998_s8, 4294952960  ;;  %p12_p3 = scmp.ge.s32.totalorder %s1313_s15, 4   ;;  %s1821_s9 = smov %s1258_s10 }
 0x170   : > { %s1822_s10 = smov %s1262_s11  ;;  %s1823_s11 = smov %s1324_s18 }
 0x171   : > { %s1824_s12 = smov %s1313_s15  ;;  %14 = sbr.rel (!%p12_p3) target bundleno = 3 (0x3), region = 63 }
 0x178   :  { %1003 = vsyncpa [#allocation3], 1 }
 0x179   :  { %1005 = vsyncpa [#allocation3 + $0x1], 1 }

</bundles_post_ra>
